<compile_context>
chip_gen: v5e
topology: v5e:2x2
jax: 0.10.0
libtpu: 0.0.40
codegen_flags: <defaults>
</compile_context>

<pallas_src>
import functools

import jax
import jax.numpy as jnp
from jax import lax
from jax.experimental import pallas as pl
from jax.experimental.pallas import tpu as pltpu


_LANES = 128                     # TPU vreg lane width
_ROW_ALIGN = 16                  # tile-row alignment: multiple of 8 (f32) and 16 (bf16)
_VMEM_LIMIT = 32 * 1024 * 1024   # explicit scoped-VMEM limit, safe on v5e/v6e/v7x


def _round_up(a, b):
    return -(-a // b) * b


def _preferred_tile_rows():
    """Rows per tile: larger on 128 MiB-VMEM chips (v5e/v6e), conservative on v7x (64 MiB)."""
    try:
        if pltpu.get_tpu_info().vmem_capacity_bytes <= 64 * 1024 * 1024:
            return 4096          # v7x: 2 MiB/f32 block, stays well inside 64 MiB with 2x buffering
        return 8192              # v5e/v6e: 4 MiB/f32 block amortizes per-step overhead
    except Exception:
        return 4096


def _stable_bce_with_logits(x, y):
    # matches torch.nn.functional.binary_cross_entropy_with_logits
    return jnp.maximum(x, 0.0) - x * y + jnp.log1p(jnp.exp(-jnp.abs(x)))


def _lane_dense(arr, rows):
    """Return a (rows, 128) lane-dense view. Metadata-only when size is lane-aligned."""
    flat = arr.reshape(-1)
    pad = rows * _LANES - flat.shape[0]
    if pad:
        # TODO(synk): handle the <128-element ragged tail fully in-kernel to avoid this copy.
        flat = jnp.pad(flat, (0, pad))
    return flat.reshape(rows, _LANES)


def _bce_reduce_kernel(pred_ref, true_ref, out_ref, acc_ref, *,
                       steps, tm, full_rows, rem_lanes, needs_mask, scale):
    i = pl.program_id(0)

    @pl.when(i == 0)
    def _():
        acc_ref[...] = jnp.zeros_like(acc_ref)

    x = pred_ref[...].astype(jnp.float32)
    y = true_ref[...].astype(jnp.float32)
    loss = _stable_bce_with_logits(x, y)

    if needs_mask:
        # Only the last grid step can contain padded lanes / partial-block garbage;
        # all interior tiles take the cheap unmasked path.
        @pl.when(i < steps - 1)
        def _():
            acc_ref[...] += jnp.sum(loss, axis=0, keepdims=True)

        @pl.when(i == steps - 1)
        def _():
            row = lax.broadcasted_iota(jnp.int32, loss.shape, 0) + i * tm
            lane = lax.broadcasted_iota(jnp.int32, loss.shape, 1)
            valid = (row < full_rows) | ((row == full_rows) & (lane < rem_lanes))
            acc_ref[...] += jnp.sum(jnp.where(valid, loss, 0.0), axis=0, keepdims=True)
    else:
        acc_ref[...] += jnp.sum(loss, axis=0, keepdims=True)

    # Fused epilogue: cross-lane reduce (XLU, free under mem-bound) + scale.
    @pl.when(i == steps - 1)
    def _():
        out_ref[...] = jnp.sum(acc_ref[...], axis=-1, keepdims=True) * scale


def _bce_elementwise_kernel(pred_ref, true_ref, out_ref):
    x = pred_ref[...].astype(jnp.float32)
    y = true_ref[...].astype(jnp.float32)
    out_ref[...] = _stable_bce_with_logits(x, y).astype(out_ref.dtype)


def cross_entropy_loss(y_pred, y_true, reduction="mean"):
    """Forward pass of Handcrafted-DP CrossEntropyLoss (BCE with logits)."""
    if y_pred.ndim == 1:
        y_pred = y_pred.reshape(-1, 1)
    if y_true.ndim == 1:
        y_true = y_true.reshape(-1, 1)
    if y_true.dtype == jnp.bool_:
        # bool refs are awkward on TPU; labels of other dtypes pass through untouched.
        y_true = y_true.astype(jnp.float32)

    logical_shape = y_pred.shape
    total = int(y_pred.size)
    rows = -(-total // _LANES)
    lane_aligned = (total == rows * _LANES)

    tm = min(_preferred_tile_rows(), _round_up(rows, _ROW_ALIGN))
    steps = -(-rows // tm)

    pred2d = _lane_dense(y_pred, rows)
    true2d = _lane_dense(y_true, rows)
    in_bytes = total * (y_pred.dtype.itemsize + y_true.dtype.itemsize)
    in_spec = pl.BlockSpec((tm, _LANES), lambda i: (i, 0))

    if reduction == "none":
        out2d = pl.pallas_call(
            _bce_elementwise_kernel,
            out_shape=jax.ShapeDtypeStruct((rows, _LANES), y_pred.dtype),
            grid=(steps,),
            in_specs=[in_spec, in_spec],
            out_specs=pl.BlockSpec((tm, _LANES), lambda i: (i, 0)),
            compiler_params=pltpu.CompilerParams(
                dimension_semantics=("parallel",),
                vmem_limit_bytes=_VMEM_LIMIT),
            cost_estimate=pl.CostEstimate(
                flops=6 * total,
                transcendentals=2 * total,
                bytes_accessed=in_bytes + total * y_pred.dtype.itemsize),
        )(pred2d, true2d)
        if lane_aligned:
            # zero-copy: no slice, no extra HBM pass
            return out2d.reshape(logical_shape)
        return out2d.reshape(-1)[:total].reshape(logical_shape)

    if reduction not in ("mean", "sum"):
        raise ValueError(f"unsupported reduction: {reduction}")

    needs_mask = (not lane_aligned) or (rows % tm != 0)
    full_rows = total // _LANES
    rem_lanes = total % _LANES
    scale = (1.0 / total) if reduction == "mean" else 1.0

    # NOTE: per-lane f32 accumulation; for multi-billion-element sums consider a
    # two-level / Kahan accumulator.
    # TODO(synk): on v7x, consider CORE_PARALLEL on a leading grid axis to engage both TCs.
    out = pl.pallas_call(
        functools.partial(_bce_reduce_kernel, steps=steps, tm=tm,
                          full_rows=full_rows, rem_lanes=rem_lanes,
                          needs_mask=needs_mask, scale=scale),
        out_shape=jax.ShapeDtypeStruct((1, 1), jnp.float32),
        grid=(steps,),
        in_specs=[in_spec, in_spec],
        out_specs=pl.BlockSpec((1, 1), lambda i: (0, 0)),
        scratch_shapes=[pltpu.VMEM((1, _LANES), jnp.float32)],
        compiler_params=pltpu.CompilerParams(
            dimension_semantics=("arbitrary",),
            vmem_limit_bytes=_VMEM_LIMIT),
        cost_estimate=pl.CostEstimate(
            flops=6 * total,
            transcendentals=2 * total,
            bytes_accessed=in_bytes + 4),
    )(pred2d, true2d)
    return out[0, 0]


def _reference(y_pred, y_true, reduction="mean"):
    if y_pred.ndim == 1:
        y_pred = y_pred.reshape(-1, 1)
    if y_true.ndim == 1:
        y_true = y_true.reshape(-1, 1)
    x = y_pred.astype(jnp.float32)
    y = y_true.astype(jnp.float32)
    loss = _stable_bce_with_logits(x, y)
    if reduction == "mean":
        return jnp.mean(loss)
    if reduction == "sum":
        return jnp.sum(loss)
    return loss.astype(y_pred.dtype)


if __name__ == "__main__":
    key = jax.random.PRNGKey(0)
    k1, k2 = jax.random.split(key)

    # 1-D logits / targets (the binary-classification path the torch module handles)
    batch = 8
    y_pred_1d = jax.random.normal(k1, (batch,), dtype=jnp.float32)
    y_true_1d = jax.random.bernoulli(k2, 0.5, (batch,)).astype(jnp.float32)

    out_mean = jax.block_until_ready(cross_entropy_loss(y_pred_1d, y_true_1d, "mean"))
    out_sum = jax.block_until_ready(cross_entropy_loss(y_pred_1d, y_true_1d, "sum"))
    out_none = jax.block_until_ready(cross_entropy_loss(y_pred_1d, y_true_1d, "none"))

    ref_mean = _reference(y_pred_1d, y_true_1d, "mean")
    ref_sum = _reference(y_pred_1d, y_true_1d, "sum")
    ref_none = _reference(y_pred_1d, y_true_1d, "none")

    assert out_none.shape == (batch, 1)
    assert jnp.allclose(out_mean, ref_mean, atol=1e-5, rtol=1e-5)
    assert jnp.allclose(out_sum, ref_sum, atol=1e-5, rtol=1e-5)
    assert jnp.allclose(out_none, ref_none, atol=1e-5, rtol=1e-5)

    # Already-2-D (N, C) multi-label logits.
    y_pred_2d = jax.random.normal(k1, (4, 8), dtype=jnp.float32)
    y_true_2d = jax.random.bernoulli(k2, 0.5, (4, 8)).astype(jnp.float32)
    out2 = jax.block_until_ready(cross_entropy_loss(y_pred_2d, y_true_2d, "mean"))
    assert jnp.allclose(out2, _reference(y_pred_2d, y_true_2d, "mean"),
                        atol=1e-5, rtol=1e-5)

    # bf16 inputs: 'none' keeps the input dtype (halved store bandwidth).
    y_pred_bf = y_pred_2d.astype(jnp.bfloat16)
    y_true_bf = y_true_2d.astype(jnp.bfloat16)
    out_bf = jax.block_until_ready(cross_entropy_loss(y_pred_bf, y_true_bf, "none"))
    assert out_bf.dtype == jnp.bfloat16
    assert jnp.allclose(out_bf.astype(jnp.float32),
                        _reference(y_pred_bf, y_true_bf, "none").astype(jnp.float32),
                        atol=2e-2, rtol=2e-2)

    # Lane-aligned case exercises the zero-copy reshape paths.
    y_pred_al = jax.random.normal(k1, (2, 128), dtype=jnp.float32)
    y_true_al = jax.random.bernoulli(k2, 0.5, (2, 128)).astype(jnp.float32)
    out_al = jax.block_until_ready(cross_entropy_loss(y_pred_al, y_true_al, "sum"))
    assert jnp.allclose(out_al, _reference(y_pred_al, y_true_al, "sum"),
                        atol=1e-4, rtol=1e-5)
    out_al_none = jax.block_until_ready(cross_entropy_loss(y_pred_al, y_true_al, "none"))
    assert out_al_none.shape == (2, 128)
    assert jnp.allclose(out_al_none, _reference(y_pred_al, y_true_al, "none"),
                        atol=1e-5, rtol=1e-5)

    print("KERNEL_OK")
</pallas_src>

<mosaic_0001>
module attributes {stable_mosaic.version = 11 : i64} {
  func.func @_bce_reduce_kernel(%arg0: i32, %arg1: memref<16x128xf32, #tpu.memory_space<vmem>>, %arg2: memref<16x128xf32, #tpu.memory_space<vmem>>, %arg3: memref<1x1xf32, #tpu.memory_space<vmem>>, %arg4: memref<1x128xf32, #tpu.memory_space<vmem>>) attributes {dimension_semantics = [#tpu.dimension_semantics<arbitrary>], iteration_bounds = array<i64: 1>, scalar_prefetch = 0 : i64, scratch_operands = 1 : i64, tpu.core_type = #tpu.core_type<tc>, window_params = [{transform_indices = @transform_0, window_bounds = array<i64: 16, 128>}, {transform_indices = @transform_1, window_bounds = array<i64: 16, 128>}, {pipeline_mode = #tpu.pipeline_mode<synchronous>, transform_indices = @transform_2, window_bounds = array<i64: 1, 1>}]} {
    %c0_i32 = arith.constant 0 : i32
    %0 = arith.cmpi eq, %arg0, %c0_i32 : i32
    %1 = arith.extui %0 : i1 to i32
    %c0_i32_0 = arith.constant 0 : i32
    %2 = arith.cmpi ne, %1, %c0_i32_0 : i32
    scf.if %2 {
      %cst_11 = arith.constant 0.000000e+00 : f32
      %24 = vector.broadcast %cst_11 : f32 to vector<1x128xf32>
      %c0_12 = arith.constant 0 : index
      %c0_13 = arith.constant 0 : index
      %25 = vector.load %arg4[%c0_12, %c0_13] : memref<1x128xf32, #tpu.memory_space<vmem>>, vector<1x128xf32>
      tpu.vector_store %arg4[%c0_12, %c0_13], %24 {strides = array<i32>} : memref<1x128xf32, #tpu.memory_space<vmem>>, vector<1x128xf32>,
    } else {
    }
    %c0 = arith.constant 0 : index
    %c0_1 = arith.constant 0 : index
    %3 = vector.load %arg1[%c0, %c0_1] : memref<16x128xf32, #tpu.memory_space<vmem>>, vector<16x128xf32>
    %c0_2 = arith.constant 0 : index
    %c0_3 = arith.constant 0 : index
    %4 = vector.load %arg2[%c0_2, %c0_3] : memref<16x128xf32, #tpu.memory_space<vmem>>, vector<16x128xf32>
    %cst = arith.constant 0.000000e+00 : f32
    %5 = vector.broadcast %cst : f32 to vector<16x128xf32>
    %6 = arith.maximumf %3, %5 : vector<16x128xf32>
    %7 = arith.mulf %3, %4 : vector<16x128xf32>
    %8 = arith.subf %6, %7 : vector<16x128xf32>
    %9 = math.absf %3 : vector<16x128xf32>
    %cst_4 = arith.constant 0.000000e+00 : f32
    %10 = vector.broadcast %cst_4 : f32 to vector<16x128xf32>
    %11 = arith.subf %10, %9 : vector<16x128xf32>
    %12 = math.exp %11 : vector<16x128xf32>
    %13 = math.log1p %12 : vector<16x128xf32>
    %14 = arith.addf %8, %13 : vector<16x128xf32>
    %c0_i32_5 = arith.constant 0 : i32
    %15 = arith.cmpi slt, %arg0, %c0_i32_5 : i32
    %16 = arith.extui %15 : i1 to i32
    %c0_i32_6 = arith.constant 0 : i32
    %17 = arith.cmpi ne, %16, %c0_i32_6 : i32
    scf.if %17 {
      %c0_11 = arith.constant 0 : index
      %c0_12 = arith.constant 0 : index
      %24 = vector.load %arg4[%c0_11, %c0_12] : memref<1x128xf32, #tpu.memory_space<vmem>>, vector<1x128xf32>
      %cst_13 = arith.constant dense<0.000000e+00> : vector<128xf32>
      %25 = vector.multi_reduction <add>, %14, %cst_13 [0] : vector<16x128xf32> to vector<128xf32>
      %26 = vector.shape_cast %25 : vector<128xf32> to vector<1x128xf32>
      %27 = arith.addf %24, %26 : vector<1x128xf32>
      %c0_14 = arith.constant 0 : index
      %c0_15 = arith.constant 0 : index
      %28 = vector.load %arg4[%c0_14, %c0_15] : memref<1x128xf32, #tpu.memory_space<vmem>>, vector<1x128xf32>
      tpu.vector_store %arg4[%c0_14, %c0_15], %27 {strides = array<i32>} : memref<1x128xf32, #tpu.memory_space<vmem>>, vector<1x128xf32>,
    } else {
    }
    %c0_i32_7 = arith.constant 0 : i32
    %18 = arith.cmpi eq, %arg0, %c0_i32_7 : i32
    %19 = arith.extui %18 : i1 to i32
    %c0_i32_8 = arith.constant 0 : i32
    %20 = arith.cmpi ne, %19, %c0_i32_8 : i32
    scf.if %20 {
      %24 = tpu.iota {dimensions = array<i32: 0>} : vector<16x128xi32>
      %c16_i32 = arith.constant 16 : i32
      %25 = arith.muli %arg0, %c16_i32 : i32
      %26 = vector.broadcast %25 : i32 to vector<16x128xi32>
      %27 = arith.addi %24, %26 : vector<16x128xi32>
      %28 = tpu.iota {dimensions = array<i32: 1>} : vector<16x128xi32>
      %c0_i32_11 = arith.constant 0 : i32
      %29 = vector.broadcast %c0_i32_11 : i32 to vector<16x128xi32>
      %30 = arith.cmpi slt, %27, %29 : vector<16x128xi32>
      %c0_i32_12 = arith.constant 0 : i32
      %31 = vector.broadcast %c0_i32_12 : i32 to vector<16x128xi32>
      %32 = arith.cmpi eq, %27, %31 : vector<16x128xi32>
      %c8_i32 = arith.constant 8 : i32
      %33 = vector.broadcast %c8_i32 : i32 to vector<16x128xi32>
      %34 = arith.cmpi slt, %28, %33 : vector<16x128xi32>
      %35 = arith.andi %32, %34 : vector<16x128xi1>
      %36 = arith.ori %30, %35 : vector<16x128xi1>
      %c0_13 = arith.constant 0 : index
      %c0_14 = arith.constant 0 : index
      %37 = vector.load %arg4[%c0_13, %c0_14] : memref<1x128xf32, #tpu.memory_space<vmem>>, vector<1x128xf32>
      %cst_15 = arith.constant 0.000000e+00 : f32
      %38 = vector.broadcast %cst_15 : f32 to vector<16x128xf32>
      %39 = arith.select %36, %14, %38 : vector<16x128xi1>, vector<16x128xf32>
      %cst_16 = arith.constant dense<0.000000e+00> : vector<128xf32>
      %40 = vector.multi_reduction <add>, %39, %cst_16 [0] : vector<16x128xf32> to vector<128xf32>
      %41 = vector.shape_cast %40 : vector<128xf32> to vector<1x128xf32>
      %42 = arith.addf %37, %41 : vector<1x128xf32>
      %c0_17 = arith.constant 0 : index
      %c0_18 = arith.constant 0 : index
      %43 = vector.load %arg4[%c0_17, %c0_18] : memref<1x128xf32, #tpu.memory_space<vmem>>, vector<1x128xf32>
      tpu.vector_store %arg4[%c0_17, %c0_18], %42 {strides = array<i32>} : memref<1x128xf32, #tpu.memory_space<vmem>>, vector<1x128xf32>,
    } else {
    }
    %c0_i32_9 = arith.constant 0 : i32
    %21 = arith.cmpi eq, %arg0, %c0_i32_9 : i32
    %22 = arith.extui %21 : i1 to i32
    %c0_i32_10 = arith.constant 0 : i32
    %23 = arith.cmpi ne, %22, %c0_i32_10 : i32
    scf.if %23 {
      %c0_11 = arith.constant 0 : index
      %c0_12 = arith.constant 0 : index
      %24 = vector.load %arg4[%c0_11, %c0_12] : memref<1x128xf32, #tpu.memory_space<vmem>>, vector<1x128xf32>
      %cst_13 = arith.constant dense<0.000000e+00> : vector<1xf32>
      %25 = vector.multi_reduction <add>, %24, %cst_13 [1] : vector<1x128xf32> to vector<1xf32>
      %26 = vector.shape_cast %25 : vector<1xf32> to vector<1x1xf32>
      %cst_14 = arith.constant 1.250000e-01 : f32
      %27 = vector.broadcast %cst_14 : f32 to vector<1x1xf32>
      %28 = arith.mulf %26, %27 : vector<1x1xf32>
      %c0_15 = arith.constant 0 : index
      %c0_16 = arith.constant 0 : index
      %29 = vector.load %arg3[%c0_15, %c0_16] : memref<1x1xf32, #tpu.memory_space<vmem>>, vector<1x1xf32>
      tpu.vector_store %arg3[%c0_15, %c0_16], %28 {strides = array<i32>} : memref<1x1xf32, #tpu.memory_space<vmem>>, vector<1x1xf32>,
    } else {
    }
    return
  }
  func.func @transform_0(%arg0: i32) -> (i32, i32) {
    %c0_i32 = arith.constant 0 : i32
    %c0_i32_0 = arith.constant 0 : i32
    return %arg0, %c0_i32 : i32, i32
  }
  func.func @transform_1(%arg0: i32) -> (i32, i32) {
    %c0_i32 = arith.constant 0 : i32
    %c0_i32_0 = arith.constant 0 : i32
    return %arg0, %c0_i32 : i32, i32
  }
  func.func @transform_2(%arg0: i32) -> (i32, i32) {
    %c0_i32 = arith.constant 0 : i32
    %c0_i32_0 = arith.constant 0 : i32
    %c0_i32_1 = arith.constant 0 : i32
    return %c0_i32, %c0_i32_0 : i32, i32
  }
}

</mosaic_0001>

<bundles_post_ra>
// kernel: tpu_custom_call.1
= control target key start
LH: loop header
LB: loop body
LE: loop exit
PB: predicated region body
PF: predicated region fallthrough
CT: control target
= control target key end

     0   :  { %7 = vsyncpa [#allocation4], 0  ;;  %s278_s0 = inlined_call_operand.hbm [shape: f32[1,128], index: 0, kind: input, shape index: {}]   ;;  %s279_s1 = inlined_call_operand.hbm [shape: f32[1,128], index: 1, kind: input, shape index: {}]   ;;  %s280_s2 = inlined_call_operand.hbm [shape: f32[1,1], index: 2, kind: output, shape index: {}]  }
   0x1   :  { %8 = vsyncpa [#allocation7], 0 }
   0x2   :  { %9 = vsyncpa [#allocation5], 0 }
   0x3   :  { %13 = vsyncadd [#allocation4], 240  ;;  %s14_s11 = sshll.u32 %s278_s0, 4  ;;  %s248_s12 = smov [#allocation3]   ;;  %s15_s11 = int_to_ptr.hbm [resolvable:$true] %s14_s11 }
   0x4   :  { %s16_s13 = sshll.u32 %s248_s12, 4  ;;  %s249_s14 = smov 16   ;;  %s17_s13 = int_to_ptr.vmem [resolvable:$true] %s16_s13 }
   0x5   :  { %s250_s15 = smov 1  }
   0x6   :  { %22 = dma.hbm_to_vmem [thread:$0]  %s15_s11, 16, %s17_s13, [#allocation4], %s249_s14, %s249_s14, %s250_s15  }
   0x7   :  { %26 = vsyncadd [#allocation7], 240  ;;  %s27_s18 = sshll.u32 %s279_s1, 4  ;;  %s251_s19 = smov [#allocation6]   ;;  %s28_s18 = int_to_ptr.hbm [resolvable:$true] %s27_s18 }
   0x8   :  { %s29_s20 = sshll.u32 %s251_s19, 4  ;;  %s30_s20 = int_to_ptr.vmem [resolvable:$true] %s29_s20 }
   0x9   :  { %35 = dma.hbm_to_vmem [thread:$0]  %s28_s18, 16, %s30_s20, [#allocation7], %s249_s14, %s249_s14, %s250_s15  }
   0xa   :  { %242 = dma.done.wait [#allocation4], 256  }
   0xb   :  { %243 = vsyncadd [#allocation4], 4294967040 }
   0xc   :  { %244 = dma.done.wait [#allocation7], 256  }
   0xd   :  { %245 = vsyncadd [#allocation7], 4294967040  ;;  %v252_v0 = vmov 0.0   ;;  %v49_v1 = vld [vmem:[#allocation3] sm:$0xff]  ;;  %v104_v6 = vlaneseq  ;;  %v51_v9 = vld [vmem:[#allocation6] sm:$0xff]  ;;  %vm135_vm4 = vcmask 1040384  }
   0xe   :  { %48 = vst [vmem:[#allocation2] sm:$0x1] %v252_v0  ;;  %v59_v2 = vand.u32 2147483647, %v49_v1  ;;  %v53_v12 = vmax.f32 %v49_v1, 0.0  ;;  %v55_v13 = vmul.f32 %v51_v9, %v49_v1  ;;  %s253_s0 = smov [#allocation8]  }
   0xf   :  { %v105_v11 = vshrl.u32 %v104_v6, 7  ;;  %v112_v15 = vand.u32 127, %v104_v6  ;;  %s147_s1 = sshll.u32 %s253_s0, 4  ;;  %s149_s23 = sshll.u32 %s280_s2, 4  ;;  %vm140_vm5 = vcmask 0   ;;  %s148_s1 = int_to_ptr.vmem [resolvable:$true] %s147_s1  ;;  %s150_s23 = int_to_ptr.hbm [resolvable:$true] %s149_s23 }
  0x10   :  { %v61_v3 = vsub.f32 0.0, %v59_v2  ;;  %v57_v18 = vsub.f32 %v53_v12, %v55_v13 }
  0x11   :  { %vm115_vm1 = vcmp.eq.s32.totalorder %v105_v11, 0  ;;  %vm117_vm2 = vcmp.lt.s32.totalorder %v112_v15, 8 }
  0x12   :  { %v63_v4 = vmul.f32 1.442695, %v61_v3  ;;  %vm118_vm3 = vmand %vm115_vm1, %vm117_vm2 }
  0x14   :  { %166 = vpow2.f32 %v63_v4 }
  0x15   :  { %v122_v28 = vld [vmem:[#allocation2] sm:$0x1] }
  0x1a   :  { %v167_v5 = vpop.eup %166 }
  0x1b   :  { %v67_v7 = vadd.f32 1.0, %v167_v5  ;;  %v70_v8 = vmul.f32 -0.5, %v167_v5  ;;  %v73_v14 = vand.u32 2147483647, %v167_v5 }
  0x1d   :  { %168 = vlog2.f32 %v67_v7  ;;  %v71_v10 = vadd.f32 1.0, %v70_v8  ;;  %vm74_vm0 = vcmp.lt.f32.partialorder %v73_v14, 0.0004427343 }
  0x1f   :  { %v72_v16 = vmul.f32 %v167_v5, %v71_v10 }
  0x23   :  { %v169_v17 = vpop.eup %168 }
  0x24   :  { %v69_v19 = vmul.f32 0.6931472, %v169_v17 }
  0x26   :  { %v75_v20 = vsel %vm74_vm0, %v72_v16, %v69_v19 }
  0x27   :  { %v85_v21 = vadd.f32 %v75_v20, %v57_v18 }
  0x29   :  { %v123_v22 = vsel %vm118_vm3, %v85_v21, 0.0 }
  0x2a   :  { %v126_v23 = vrot.slane %v123_v22, 4 }
  0x2c   :  { %v127_v24 = vadd.f32 %v126_v23, %v123_v22 }
  0x2e   :  { %v128_v25 = vrot.slane %v127_v24, 2 }
  0x30   :  { %v129_v26 = vadd.f32 %v128_v25, %v127_v24 }
  0x32   :  { %v130_v27 = vrot.slane %v129_v26, 1 }
  0x34   :  { %v131_v29 = vadd.f32 %v130_v27, %v129_v26 }
  0x36   :  { %v132_v30 = vadd.f32 %v131_v29, %v122_v28 }
  0x38   :  { %133 = vst [vmem:[#allocation2] sm:$0x1] %v132_v30 }
  0x3f   :  { %v134_v31 = vld [vmem:[#allocation2] sm:$0x1] }
  0x40   :  { %v136_v32 = vsel %vm135_vm4, %v134_v31, 0.0 }
  0x41   :  { %137 = vadd.xlane.f32.xlu0 %v136_v32 }
  0xb4   :  { %v138_v33 = vpop.xlane.xlu0 %137 }
  0xb5   :  { %v139_v34 = vmul.f32 0.125, %v138_v33 }
  0xb7   :  { %141 = vst.msk [vmem:[#allocation8] sm:$0x1] %vm140_vm5, %v139_v34 }
  0xb8   :  { %152 = dma.vmem_to_hbm [thread:$0]  %s148_s1, 16, %s150_s23, [#allocation5]  }
  0xb9   :  { %246 = dma.done.wait [#allocation5], 16  }
  0xba   :  { %247 = vsyncadd [#allocation5], 4294967280 }
  0xbb   :  { %157 = vsyncpa [#allocation4], 1 }
  0xbc   :  { %158 = vsyncpa [#allocation7], 1 }
  0xbd   :  { %159 = vsyncpa [#allocation5], 1 }

</bundles_post_ra>
